<compile_context>
chip_gen: v6e
topology: v6e:2x2x1
jax: 0.10.0
libtpu: 0.0.40
codegen_flags: <defaults>
</compile_context>

<pallas_src>
import jax
import jax.numpy as jnp
from jax import lax
from jax.experimental import pallas as pl
from jax.experimental.pallas import tpu as pltpu


def _round_up(x, m):
    return (x + m - 1) // m * m


# ---------------------------------------------------------------------------
# Setup glue: N:M structured-sparsity mask (mirror of compute_mask in PyTorch).
# This is a parameter-configuration step (__init__ / set_sample_config), not
# the hot path, so it stays in plain JAX.
# ---------------------------------------------------------------------------
def compute_mask_jax(w, N, M):
    out_c, in_c = w.shape
    assert in_c % M == 0, f"in_features ({in_c}) must be divisible by M ({M})"
    nprune = int(M * (1 - N / M))
    if nprune == 0:
        return jnp.ones_like(w)
    t = jnp.abs(w).reshape(out_c, -1, M)
    order = jnp.argsort(t, axis=-1)            # ascending |w| inside each group
    ranks = jnp.argsort(order, axis=-1)
    mask = (ranks >= nprune).astype(w.dtype)   # drop nprune smallest per group
    # TODO(synk): tie-breaking among equal-magnitude elements may differ from
    # torch.topk, but the N:M sparsity pattern and numerics are equivalent.
    return mask.reshape(out_c, in_c)


# ---------------------------------------------------------------------------
# Pallas kernel: tiled  y = x @ W_masked^T + b  with f32 accumulation.
# ---------------------------------------------------------------------------
def _sparse_linear_kernel(x_ref, w_ref, b_ref, o_ref, acc_ref):
    k = pl.program_id(2)

    @pl.when(k == 0)
    def _():
        acc_ref[...] = jnp.zeros_like(acc_ref)

    # (tm, tk) . (tn, tk) contracted on K -> (tm, tn); weight consumed in its
    # native (out_f, in_f) layout, no XLU transpose.
    acc_ref[...] += lax.dot_general(
        x_ref[...], w_ref[...],
        dimension_numbers=(((1,), (1,)), ((), ())),
        preferred_element_type=jnp.float32)

    @pl.when(k == pl.num_programs(2) - 1)
    def _():
        o_ref[...] = (acc_ref[...] + b_ref[...]).astype(o_ref.dtype)


def sparse_linear(x, w_masked, bias, *, tm=None, tn=None, tk=None):
    """x: (B, in_f); w_masked: (out_f, in_f); bias: (out_f,) -> (B, out_f)."""
    B, in_f = x.shape
    out_f, in_f_w = w_masked.shape
    assert in_f == in_f_w
    out_dtype = x.dtype
    out_isize = jnp.dtype(out_dtype).itemsize

    def _pick(dim, explicit):
        if explicit is not None:
            return explicit
        padded = _round_up(dim, 128)
        for cand in (512, 384, 256, 128):   # prefer MXU-filling 256+ tiles
            if padded % cand == 0:
                return cand
        return 128

    tm = (min(_round_up(B, 8), 256) if tm is None else tm)
    tn = _pick(out_f, tn)
    tk = _pick(in_f, tk)

    Bp = _round_up(B, tm)
    Np = _round_up(out_f, tn)
    Kp = _round_up(in_f, tk)

    # bf16 operands (halve HBM/VMEM traffic, native MXU rate), lane-dense pads.
    xp = jnp.zeros((Bp, Kp), jnp.bfloat16).at[:B, :in_f].set(
        x.astype(jnp.bfloat16))
    wp = jnp.zeros((Np, Kp), jnp.bfloat16).at[:out_f, :in_f].set(
        w_masked.astype(jnp.bfloat16))
    bp = jnp.zeros((1, Np), jnp.float32).at[0, :out_f].set(
        bias.astype(jnp.float32))

    grid = (Bp // tm, Np // tn, Kp // tk)

    cost = pl.CostEstimate(
        flops=2 * Bp * Np * Kp,
        transcendentals=0,
        bytes_accessed=(xp.size * 2 + wp.size * 2 + bp.size * 4
                        + Bp * Np * out_isize),
    )

    out = pl.pallas_call(
        _sparse_linear_kernel,
        out_shape=jax.ShapeDtypeStruct((Bp, Np), out_dtype),
        grid_spec=pltpu.PrefetchScalarGridSpec(
            num_scalar_prefetch=0,
            grid=grid,
            in_specs=[
                pl.BlockSpec((tm, tk), lambda i, j, k: (i, k)),   # x tile
                pl.BlockSpec((tn, tk), lambda i, j, k: (j, k)),   # weight tile
                pl.BlockSpec((1, tn), lambda i, j, k: (0, j)),    # bias tile
            ],
            out_specs=pl.BlockSpec((tm, tn), lambda i, j, k: (i, j)),
            scratch_shapes=[pltpu.VMEM((tm, tn), jnp.float32)],
        ),
        compiler_params=pltpu.CompilerParams(
            dimension_semantics=("parallel", "parallel", "arbitrary"),
            vmem_limit_bytes=32 * 1024 * 1024),
        cost_estimate=cost,
    )(xp, wp, bp)

    return out[:B, :out_f]


# ---------------------------------------------------------------------------
# Module-equivalent wrapper.
# ---------------------------------------------------------------------------
class SparseLinearSuperPallas:
    def __init__(self, in_features, out_features, key, bias=True,
                 sparsity_config=(2, 4)):
        self.in_features = in_features
        self.out_features = out_features
        kw, kb = jax.random.split(key)
        # PyTorch module inits weight/bias to ones; use deterministic random
        # values so the N:M mask is non-trivial and well-defined.
        self.weight = jax.random.normal(kw, (out_features, in_features),
                                        dtype=jnp.float32)
        self.bias = (jax.random.normal(kb, (out_features,), dtype=jnp.float32)
                     if bias else None)
        self.set_sample_config(sparsity_config)

    def set_sample_config(self, sample_config):
        # Mask is static per config: fold it into the weight once here so the
        # kernel streams half the weight-side HBM bytes. Numerics unchanged.
        self.sparsity_config = sample_config
        n, m = sample_config
        self.mask = compute_mask_jax(self.weight, n, m)
        self.weight_masked = self.weight * self.mask

    def __call__(self, x):
        # F.linear supports arbitrary leading dims; flatten them.
        lead = x.shape[:-1]
        x2 = x.reshape(-1, self.in_features)
        b = (self.bias if self.bias is not None
             else jnp.zeros((self.out_features,), jnp.float32))
        y = sparse_linear(x2, self.weight_masked, b)
        return y.reshape(*lead, self.out_features)


if __name__ == "__main__":
    key = jax.random.PRNGKey(0)
    k_x, k_p = jax.random.split(key)

    batch, in_features, out_features = 8, 256, 256
    x = jax.random.normal(k_x, (batch, in_features), dtype=jnp.float32)

    layer = SparseLinearSuperPallas(in_features, out_features, k_p,
                                    bias=True, sparsity_config=(2, 4))

    # Force small tiles at this demo size so the K-accumulation / N-tiling
    # pipeline is actually exercised (grid = (1, 2, 2)).
    y = sparse_linear(x, layer.weight_masked, layer.bias, tm=8, tn=128, tk=128)
    y = jax.block_until_ready(y)

    # References for the PyTorch forward.
    w_masked = layer.weight * layer.mask
    y_ref_f32 = x @ w_masked.T + layer.bias
    y_ref_bf16 = (jnp.dot(x.astype(jnp.bfloat16),
                          w_masked.astype(jnp.bfloat16).T,
                          preferred_element_type=jnp.float32)
                  + layer.bias).astype(x.dtype)

    assert y.shape == (batch, out_features)
    assert jnp.allclose(y, y_ref_bf16, atol=1e-2, rtol=1e-2), \
        "mismatch vs bf16 reference"
    assert jnp.allclose(y, y_ref_f32, atol=2.5e-1, rtol=5e-2), \
        "mismatch vs f32 reference"

    # Also exercise the module-style path with automatic tile selection.
    y2 = jax.block_until_ready(layer(x))
    assert y2.shape == (batch, out_features)
    assert jnp.allclose(y2, y_ref_bf16, atol=1e-2, rtol=1e-2), \
        "module path mismatch vs bf16 reference"

    print("KERNEL_OK")
</pallas_src>

<mosaic_0001>
module attributes {stable_mosaic.version = 11 : i64} {
  func.func @_sparse_linear_kernel(%arg0: i32, %arg1: i32, %arg2: i32, %arg3: memref<8x128xbf16, #tpu.memory_space<vmem>>, %arg4: memref<128x128xbf16, #tpu.memory_space<vmem>>, %arg5: memref<1x128xf32, #tpu.memory_space<vmem>>, %arg6: memref<8x128xf32, #tpu.memory_space<vmem>>, %arg7: memref<8x128xf32, #tpu.memory_space<vmem>>) attributes {dimension_semantics = [#tpu.dimension_semantics<parallel>, #tpu.dimension_semantics<parallel>, #tpu.dimension_semantics<arbitrary>], iteration_bounds = array<i64: 1, 2, 2>, scalar_prefetch = 0 : i64, scratch_operands = 1 : i64, tpu.core_type = #tpu.core_type<tc>, window_params = [{transform_indices = @transform_0, window_bounds = array<i64: 8, 128>}, {transform_indices = @transform_1, window_bounds = array<i64: 128, 128>}, {transform_indices = @transform_2, window_bounds = array<i64: 1, 128>}, {transform_indices = @transform_3, window_bounds = array<i64: 8, 128>}]} {
    %c0_i32 = arith.constant 0 : i32
    %0 = arith.cmpi eq, %arg2, %c0_i32 : i32
    %1 = arith.extui %0 : i1 to i32
    %c0_i32_0 = arith.constant 0 : i32
    %2 = arith.cmpi ne, %1, %c0_i32_0 : i32
    scf.if %2 {
      %cst_9 = arith.constant 0.000000e+00 : f32
      %12 = vector.broadcast %cst_9 : f32 to vector<8x128xf32>
      %c0_10 = arith.constant 0 : index
      %c0_11 = arith.constant 0 : index
      %13 = vector.load %arg7[%c0_10, %c0_11] : memref<8x128xf32, #tpu.memory_space<vmem>>, vector<8x128xf32>
      tpu.vector_store %arg7[%c0_10, %c0_11], %12 {strides = array<i32>} : memref<8x128xf32, #tpu.memory_space<vmem>>, vector<8x128xf32>,
    } else {
    }
    %c0 = arith.constant 0 : index
    %c0_1 = arith.constant 0 : index
    %3 = vector.load %arg7[%c0, %c0_1] : memref<8x128xf32, #tpu.memory_space<vmem>>, vector<8x128xf32>
    %c0_2 = arith.constant 0 : index
    %c0_3 = arith.constant 0 : index
    %4 = vector.load %arg3[%c0_2, %c0_3] : memref<8x128xbf16, #tpu.memory_space<vmem>>, vector<8x128xbf16>
    %c0_4 = arith.constant 0 : index
    %c0_5 = arith.constant 0 : index
    %5 = vector.load %arg4[%c0_4, %c0_5] : memref<128x128xbf16, #tpu.memory_space<vmem>>, vector<128x128xbf16>
    %cst = arith.constant dense<0.000000e+00> : vector<8x128xf32>
    %6 = tpu.matmul %4, %5, %cst {dimension_numbers = #tpu.dot_dimension_numbers<[1], [1], [0], [0], [0, 0, 1, 0], [], []>} : vector<8x128xbf16>, vector<128x128xbf16>, vector<8x128xf32> -> vector<8x128xf32>
    %7 = arith.addf %3, %6 : vector<8x128xf32>
    %c0_6 = arith.constant 0 : index
    %c0_7 = arith.constant 0 : index
    %8 = vector.load %arg7[%c0_6, %c0_7] : memref<8x128xf32, #tpu.memory_space<vmem>>, vector<8x128xf32>
    tpu.vector_store %arg7[%c0_6, %c0_7], %7 {strides = array<i32>} : memref<8x128xf32, #tpu.memory_space<vmem>>, vector<8x128xf32>,
    %c1_i32 = arith.constant 1 : i32
    %9 = arith.cmpi eq, %arg2, %c1_i32 : i32
    %10 = arith.extui %9 : i1 to i32
    %c0_i32_8 = arith.constant 0 : i32
    %11 = arith.cmpi ne, %10, %c0_i32_8 : i32
    scf.if %11 {
      %c0_9 = arith.constant 0 : index
      %c0_10 = arith.constant 0 : index
      %12 = vector.load %arg7[%c0_9, %c0_10] : memref<8x128xf32, #tpu.memory_space<vmem>>, vector<8x128xf32>
      %c0_11 = arith.constant 0 : index
      %c0_12 = arith.constant 0 : index
      %13 = vector.load %arg5[%c0_11, %c0_12] : memref<1x128xf32, #tpu.memory_space<vmem>>, vector<1x128xf32>
      %14 = vector.broadcast %13 : vector<1x128xf32> to vector<8x128xf32>
      %15 = arith.addf %12, %14 : vector<8x128xf32>
      %c0_13 = arith.constant 0 : index
      %c0_14 = arith.constant 0 : index
      %16 = vector.load %arg6[%c0_13, %c0_14] : memref<8x128xf32, #tpu.memory_space<vmem>>, vector<8x128xf32>
      tpu.vector_store %arg6[%c0_13, %c0_14], %15 {strides = array<i32>} : memref<8x128xf32, #tpu.memory_space<vmem>>, vector<8x128xf32>,
    } else {
    }
    return
  }
  func.func @transform_0(%arg0: i32, %arg1: i32, %arg2: i32) -> (i32, i32) {
    %c0_i32 = arith.constant 0 : i32
    return %arg0, %arg2 : i32, i32
  }
  func.func @transform_1(%arg0: i32, %arg1: i32, %arg2: i32) -> (i32, i32) {
    %c0_i32 = arith.constant 0 : i32
    return %arg1, %arg2 : i32, i32
  }
  func.func @transform_2(%arg0: i32, %arg1: i32, %arg2: i32) -> (i32, i32) {
    %c0_i32 = arith.constant 0 : i32
    %c0_i32_0 = arith.constant 0 : i32
    return %c0_i32, %arg1 : i32, i32
  }
  func.func @transform_3(%arg0: i32, %arg1: i32, %arg2: i32) -> (i32, i32) {
    %c0_i32 = arith.constant 0 : i32
    return %arg0, %arg1 : i32, i32
  }
}

</mosaic_0001>

<bundles_post_ra>
// kernel: tpu_custom_call.1
= control target key start
LH: loop header
LB: loop body
LE: loop exit
PB: predicated region body
PF: predicated region fallthrough
CT: control target
= control target key end

     0   :  { %s1282_s0 = inlined_call_operand.hbm [shape: bf16[8,256], index: 0, kind: input, shape index: {}]   ;;  %s1283_s1 = inlined_call_operand.hbm [shape: bf16[256,256], index: 1, kind: input, shape index: {}]   ;;  %s1284_s2 = inlined_call_operand.vmem [shape: f32[1,256], index: 2, kind: input, shape index: {}]   ;;  %s1285_s3 = inlined_call_operand.hbm [shape: f32[8,256], index: 3, kind: output, shape index: {}]  }
   0x1   :  { %1293 = sst [smem:[#allocation21_spill]] %s1282_s0 }
   0x2   :  { %8 = vsyncpa [#allocation4], 0 }
   0x3   :  { %10 = vsyncpa [#allocation4 + $0x1], 0 }
   0x4   :  { %11 = vsyncpa [#allocation7], 0 }
   0x5   :  { %13 = vsyncpa [#allocation7 + $0x1], 0 }
   0x6   :  { %14 = vsyncpa [#allocation5], 0 }
   0x7   :  { %16 = vsyncpa [#allocation5 + $0x1], 0  ;;  %s975_s12 = smov 0   ;;  %s977_s13 = smov 0  }
   0x8   :  { %s979_s14 = smov 0   ;;  %s981_s15 = smov 0  }
   0x9   :  { %s983_s16 = smov 0   ;;  %s985_s17 = smov 0  }
   0xa   :  { %s987_s18 = smov 0   ;;  %s989_s19 = smov 0  }
   0xb   :  { %s991_s20 = smov 0   ;;  %s993_s21 = smov 0  }
   0xc   :  { %s995_s22 = smov 0   ;;  %s997_s23 = smov 0  }
   0xd   :  { %s999_s24 = smov 0   ;;  %s1001_s25 = smov 0  }
   0xe LB: > { %1294 = sst [smem:[#allocation12_spill]] %s892_s12  ;;  %s536_s26 = sadd.s32 4294967295, %s944_s25   ;;  %s944_s25 = sphi %s1001_s25, %s22_s25   ;;  %s940_s24 = sphi %s999_s24, %s1337_s24   ;;  %s936_s23 = sphi %s997_s23, %s1336_s23   ;;  %s932_s22 = sphi %s995_s22, %s1335_s22   ;;  %s928_s21 = sphi %s993_s21, %s1334_s21   ;;  %s924_s20 = sphi %s991_s20, %s1324_s20   ;;  %s920_s19 = sphi %s989_s19, %s1333_s19   ;;  %s916_s18 = sphi %s987_s18, %s1332_s18   ;;  %s912_s17 = sphi %s985_s17, %s1331_s17   ;;  %s908_s16 = sphi %s983_s16, %s1330_s16   ;;  %s904_s15 = sphi %s981_s15, %s1329_s15   ;;  %s900_s14 = sphi %s979_s14, %s1321_s14   ;;  %s896_s13 = sphi %s977_s13, %s1328_s13   ;;  %s892_s12 = sphi %s975_s12, %s1327_s12  }
   0xf   : > { %1295 = sst [smem:[#allocation13_spill]] %s900_s14  ;;  %s34_s28 = sadd.s32 1, %s936_s23 }
  0x10   : > { %1296 = sst [smem:[#allocation14_spill]] %s924_s20  ;;  %s37_s29 = sadd.s32 1, %s940_s24 }
  0x11   : > { %p35_p0 = scmp.ge.s32.totalorder %s34_s28, 2  ;;  %s50_s30 = sadd.s32 1, %s924_s20 }
  0x12   : > { %p57_p1 = scmp.ne.s32.totalorder %s924_s20, %s920_s19  ;;  %p58_p2 = scmp.eq.s32.totalorder %s944_s25, 0 }
  0x13   : > { %s1339_s28 = smov (%p35_p0, %s34_s28), 0  ;;  %s1341_s29 = smov (!%p35_p0, %s37_s29), %s940_s24 }
  0x14   : > { %1297 = sst [smem:[#allocation15_spill]] %s1339_s28  ;;  %s46_s4 = ssub.s32 %s936_s23, %s1339_s28 }
  0x15   : > { %p1058_p3 = por %p58_p2, %p57_p1  ;;  %p39_p4 = scmp.ge.s32.totalorder %s1341_s29, 2 }
  0x16   : > { %p48_p5 = scmp.eq.s32.totalorder %s46_s4, 0  ;;  %p63_p6 = scmp.ne.s32.totalorder %s920_s19, %s916_s18 }
  0x17   : > { %p1065_p7 = scmp.eq.s32.totalorder %s536_s26, 0  ;;  %s1343_s29 = smov (%p39_p4, %s1341_s29), 0 }
  0x18   : > { %1300 = sst [smem:[#allocation16_spill]] %s1343_s29  ;;  %s73_s9 = ssub.s32 %s940_s24, %s1343_s29 }
  0x19   : > { %s1072_s7 = scalar_select %p48_p5, %s924_s20, %s50_s30  }
  0x1a   : > { %p1076_p8 = por %p1065_p7, %p63_p6  ;;  %s75_s10 = sor.u32 %s73_s9, %s46_s4 }
  0x1b   : > { %1301 = sst [smem:[#allocation17_spill]] %s1072_s7  ;;  %s78_s11 = sadd.s32 1, %s912_s17 }
  0x1c   : > { %p76_p9 = scmp.eq.s32.totalorder %s75_s10, 0  ;;  %p85_p10 = scmp.ne.s32.totalorder %s912_s17, %s908_s16 }
  0x1d   : > { %p91_p11 = scmp.ne.s32.totalorder %s908_s16, %s904_s15  ;;  %p130_p12 = scmp.eq.s32.totalorder %s73_s9, 0 }
  0x1e   : > { %s1088_s18 = scalar_select %p76_p9, %s912_s17, %s78_s11  }
  0x1f   : > { %p1092_p13 = por %p85_p10, %p58_p2  ;;  %p1098_p0 = por %p91_p11, %p1065_p7 }
  0x20   : > { %1303 = sst [smem:[#allocation18_spill]] %s1088_s18  ;;  %s132_s4 = sadd.s32 1, %s900_s14 }
  0x21   : > { %p142_p1 = scmp.ne.s32.totalorder %s900_s14, %s896_s13  ;;  %p143_p4 = scmp.eq.s32.totalorder %s536_s26, 3 }
  0x22   : > { %s1106_s10 = scalar_select %p130_p12, %s900_s14, %s132_s4  }
  0x23   : > { %p148_p5 = scmp.ne.s32.totalorder %s896_s13, %s892_s12  ;;  %s1307_s15 = sadd.s32 4294967294, %s944_s25  }
  0x24   : > { %1306 = sst [smem:[#allocation19_spill]] %s1106_s10  ;;  %p149_p2 = scmp.eq.s32.totalorder %s1307_s15, 3 }
  0x25   : > { %p1114_p6 = por %p143_p4, %p142_p1  ;;  %p612_p7 = scmp.lt.s32.totalorder %s944_s25, 4 }
  0x26   : > { %p1119_p9 = por %p149_p2, %p148_p5  ;;  %s169_s11 = sand.u32 1, %s924_s20  }
  0x27   : > { %s1308_s9 = scalar_select %p1114_p6, 1, 0 }
  0x28   : > { %s1309_s6 = scalar_select %p1119_p9, 1, 0 }
  0x29   : > { %s540_s29 = sshll.u32 %s169_s11, 2  ;;  %s541_s4 = sshll.u32 %s936_s23, 6 }
  0x2a   : > { %1310 = sst [smem:[#allocation20_spill]] %s1309_s6  ;;  %s173_s18 = scalar_lea.vmem [#allocation3], %s540_s29 }
  0x2b   : > { %s1311_s0 = sld [smem:[#allocation21_spill]]  ;;  %s182_s10 = sshll.u32 %s173_s18, 4  ;;  %s183_s10 = int_to_ptr.vmem [resolvable:$true] %s182_s10 }
  0x2c   : > { %p1130_p10 = pnand %p612_p7, %p1058_p3  ;;  %s565_s14 = sshll.u32 %s940_s24, 5 }
  0x2d   : > { %p1137_p11 = pnand %p612_p7, %p1092_p13  ;;  %s199_s20 = sadd.s32 %s936_s23, %s565_s14 }
  0x2e   : > { %s170_s12 = scalar_lea.sflag [#allocation4], %s169_s11  ;;  %p742_p12 = pneg %p1130_p10 }
  0x2f   : > { %s753_s28 = scalar_lea.vmem %s183_s10, 64  ;;  %s946_s29 = smov [#allocation3]  }
  0x30   : > { %p754_p1 = scmp.ne.s32.totalorder %s183_s10, %s753_s28  ;;  %s758_s5 = sshll.u32 %s946_s29, 4  ;;  %s759_s5 = int_to_ptr.vmem [resolvable:$false] %s758_s5 }
  0x31   : > { %s180_s26 = scalar_lea.hbm %s1311_s0, %s541_s4  ;;  %s760_s7 = scalar_lea.vmem %s759_s5, 128 }
  0x32   : > { %p756_p4 = pnand %p754_p1, %p742_p12  ;;  %p761_p3 = scmp.lt.s32.totalorder %s183_s10, %s759_s5 }
  0x33   : > { %p762_p2 = scmp.lt.s32.totalorder %s760_s7, %s753_s28 }
  0x34   : > { %p757_p5 = pneg %p756_p4 }
  0x35   : > { %p763_p9 = por %p762_p2, %p761_p3 }
  0x37   : > { %p764_p6 = pnand %p763_p9, %p757_p5 }
  0x39   : > { %767 = shalt.err (!%p764_p6)
}
  0x3a   : > { %604 = dma.hbm_to_vmem [thread:$0]  (!%p1130_p10), %s180_s26, 64, %s183_s10, %s170_s12  }
  0x3b   : > { %p546_p13 = scmp.ge.s32.totalorder %s944_s25, 1  ;;  %p216_p7 = scmp.lt.s32.totalorder %s944_s25, 5 }
  0x3c   : > { %s189_s14 = sand.u32 1, %s912_s17   ;;  %s545_s11 = sshll.u32 %s199_s20, 6 }
  0x3d   : > { %s542_s18 = sshll.u32 %s189_s14, 6  ;;  %p1149_p12 = pnand %p546_p13, %p216_p7 }
  0x3e   : > { %s193_s4 = scalar_lea.vmem [#allocation6], %s542_s18  ;;  %s201_s15 = scalar_lea.hbm %s1283_s1, %s545_s11 }
  0x3f   : > { %s202_s28 = sshll.u32 %s193_s4, 4  ;;  %s190_s7 = scalar_lea.sflag [#allocation7], %s189_s14  ;;  %s203_s28 = int_to_ptr.vmem [resolvable:$true] %s202_s28 }
  0x40   : > { %p770_p6 = pneg %p1137_p11  ;;  %s781_s12 = scalar_lea.vmem %s203_s28, 1024 }
  0x41   : > { %p782_p9 = scmp.ne.s32.totalorder %s203_s28, %s781_s12  ;;  %s947_s10 = smov [#allocation6]  }
  0x42   : > { %s786_s26 = sshll.u32 %s947_s10, 4  ;;  %s787_s26 = int_to_ptr.vmem [resolvable:$false] %s786_s26 }
  0x43   : > { %p784_p10 = pnand %p782_p9, %p770_p6  ;;  %s788_s0 = scalar_lea.vmem %s787_s26, 2048 }
  0x44   : > { %p789_p4 = scmp.lt.s32.totalorder %s203_s28, %s787_s26  ;;  %p790_p5 = scmp.lt.s32.totalorder %s788_s0, %s781_s12 }
  0x45   : > { %p785_p1 = pneg %p784_p10 }
  0x46   : > { %p791_p3 = por %p790_p5, %p789_p4 }
  0x48   : > { %p792_p2 = pnand %p791_p3, %p785_p1 }
  0x4a   : > { %795 = shalt.err (!%p792_p2)
}
  0x4b   : > { %s948_s20 = smov 128   ;;  %s949_s18 = smov 64  }
  0x4c   : > { %s950_s11 = smov 4   ;;  %220 = sbr.rel (%p1149_p12) target bundleno = 391 (0x187), region = 32 }
  0x4d   : > { %607 = dma.hbm_to_vmem [thread:$0]  (!%p1137_p11), %s201_s15, 1024, %s203_s28, %s190_s7, %s948_s20, %s949_s18, %s950_s11  }
  0x4e   : > { %s222_s14 = sand.u32 (!%p1149_p12), 1, %s920_s19  }
  0x4f   : > { %s1163_s4 = sshll.u32 (!%p1149_p12), %s222_s14, 2  ;;  %s223_s29 = scalar_lea.sflag (!%p1149_p12), [#allocation4], %s222_s14 }
  0x50   : > { %s226_s0 = scalar_lea.vmem (!%p1149_p12), [#allocation3], %s1163_s4 }
  0x51   : > { %879 = dma.done.wait (%p1076_p8), %s223_s29, 64  }
  0x52   : > { %881 = vsyncadd (%p1076_p8), %s223_s29, 4294967232  ;;  %s231_s6 = sand.u32 1, %s908_s16  }
  0x53   : > { %s548_s28 = sshll.u32 %s231_s6, 6  ;;  %s232_s5 = scalar_lea.sflag [#allocation7], %s231_s6 }
  0x54   : > { %s1171_s30 = scalar_lea.vmem [#allocation6], %s548_s28 }
  0x55   : > { %883 = dma.done.wait (%p1098_p0), %s232_s5, 1024  }
  0x56   : > { %885 = vsyncadd (%p1098_p0), %s232_s5, 4294966272  ;;  %s263_s15 = sand.u32 1, %s896_s13   ;;  %p267_p11 = scmp.lt.s32.totalorder %s932_s22, 1 }
  0x57   : > { %s1181_s8 = sshll.u32 %s263_s15, 3  ;;  %p550_p8 = scmp.ne.s32.totalorder %s928_s21, 0 }
  0x58   : > { %s1184_s7 = scalar_select %p267_p11, %s932_s22, 1 }
  0x59   : > { %s265_s20 = scalar_lea.vmem [#allocation8], %s1181_s8  ;;  %274 = sbr.rel (%p550_p8) target bundleno = 96 (0x60), region = 44 }
  0x5a   : > { %s269_s26 = scalar_lea.vmem %s1284_s2, %s1184_s7 }
  0x5e   : > { %v951_v0 = vmov 0.0  }
  0x5f   : > { %275 = vst [vmem:[#allocation2] sm:$0xff] %v951_v0 }
  0x60 PF: > { %v732_v1 = vld [vmem:[%s1171_s30 + $0x38] sm:$0xff]   ;;  %v952_v2 = vmov 0.0   ;;  %vm953_vm0 = vmmov 0   ;;  %v733_v3 = vld [vmem:[%s1171_s30 + $0x30] sm:$0xff]   ;;  %v734_v4 = vld [vmem:[%s1171_s30 + $0x28] sm:$0xff]   ;;  %p559_p0 = scmp.ne.s32.totalorder %s928_s21, 1 }
  0x61   : > { %575 = vmatprep.subr.bf16.mxu0 %v952_v2  ;;  %591 = vmatprep.mubr.msk.bf16.mxu0 %vm953_vm0, %v952_v2  ;;  %v735_v5 = vld [vmem:[%s1171_s30 + $0x20] sm:$0xff]   ;;  %v736_v6 = vld [vmem:[%s1171_s30 + $0x18] sm:$0xff]   ;;  %v737_v7 = vld [vmem:[%s1171_s30 + $0x10] sm:$0xff]  }
  0x62   : > { %576 = vmatpush3.bf16.xpose.msra.mxu0 %v732_v1  ;;  %v738_v8 = vld [vmem:[%s1171_s30 + $0x8] sm:$0xff]   ;;  %v739_v9 = vld [vmem:[%s1171_s30] sm:$0xff]   ;;  %v277_v10 = vld [vmem:[%s226_s0] sm:$0xf] }
  0x63   : > { %577 = vmatprep.subr.bf16.mxu0 %v952_v2 }
  0x66   : > { %v276_v11 = vld [vmem:[#allocation2] sm:$0xff] }
  0x6a   : > { %578 = vmatpush3.bf16.xpose.msra.mxu0 %v733_v3 }
  0x6b   : > { %579 = vmatprep.subr.bf16.mxu0 %v952_v2 }
  0x72   : > { %580 = vmatpush3.bf16.xpose.msra.mxu0 %v734_v4 }
  0x73   : > { %581 = vmatprep.subr.bf16.mxu0 %v952_v2 }
  0x7a   : > { %582 = vmatpush3.bf16.xpose.msra.mxu0 %v735_v5 }
  0x7b   : > { %583 = vmatprep.subr.bf16.mxu0 %v952_v2 }
  0x82   : > { %584 = vmatpush3.bf16.xpose.msra.mxu0 %v736_v6 }
  0x83   : > { %585 = vmatprep.subr.bf16.mxu0 %v952_v2 }
  0x8a   : > { %586 = vmatpush3.bf16.xpose.msra.mxu0 %v737_v7 }
  0x8b   : > { %587 = vmatprep.subr.bf16.mxu0 %v952_v2 }
  0x92   : > { %588 = vmatpush3.bf16.xpose.msra.mxu0 %v738_v8 }
  0x93   : > { %589 = vmatprep.subr.bf16.mxu0 %v952_v2 }
  0x9a   : > { %590 = vmatpush3.bf16.xpose.msra.mxu0 %v739_v9 }
  0xa1   : > { %592 = vmatmul.mubr.bf16.vlgmr.msra.gmra.mxu0 %v277_v10 }
 0x161   : > { %v376_v12 = vpop.f32.mrf.mxu0 }
 0x162   : > { %v382_v13 = vadd.f32 %v376_v12, %v276_v11 }
 0x163   : > { %v593_v14 = vpop.f32.mrf.mxu0  ;;  %387 = sbr.rel (%p559_p0) target bundleno = 367 (0x16f), region = 48 }
 0x164   : > { %383 = vst [vmem:[#allocation2] sm:$0xff] %v382_v13 }
 0x165   : > { %v379_v15 = vpop.f32.mrf.mxu0 }
 0x167   : > { %v594_v16 = vpop.f32.mrf.mxu0 }
 0x168   : > { %v560_v18 = vld [vmem:[%s269_s26] ss:$0 sm:$0xff] }
 0x16b   : > { %v388_v17 = vld [vmem:[#allocation2] sm:$0xff] }
 0x16c   : > { %v396_v19 = vadd.f32 %v560_v18, %v388_v17 }
 0x16e   : > { %397 = vst [vmem:[%s265_s20] sm:$0xff] %v396_v19 }
 0x16f PF: > { %s562_s11 = sshll.u32 %s932_s22, 7  ;;  %s414_s29 = sshll.u32 %s265_s20, 4  ;;  %s415_s29 = int_to_ptr.vmem [resolvable:$true] %s414_s29 }
 0x170   : > { %s412_s4 = scalar_lea.hbm %s1285_s3, %s562_s11  ;;  %s399_s0 = scalar_lea.sflag [#allocation5], %s263_s15 }
 0x171   : > { %s796_s6 = scalar_lea.vmem %s415_s29, 128  ;;  %p1315_p7 = scmp.ne.s32.totalorder %s1308_s9, 0 }
 0x172   : > { %p797_p13 = scmp.ne.s32.totalorder %s415_s29, %s796_s6  ;;  %s954_s28 = smov [#allocation8]  }
 0x173   : > { %s800_s5 = sshll.u32 %s954_s28, 4  ;;  %s801_s5 = int_to_ptr.vmem [resolvable:$false] %s800_s5 }
 0x174   : > { %p798_p12 = pnand %p797_p13, %p1315_p7  ;;  %s802_s30 = scalar_lea.vmem %s801_s5, 256 }
 0x175   : > { %p803_p9 = scmp.lt.s32.totalorder %s415_s29, %s801_s5  ;;  %p804_p10 = scmp.lt.s32.totalorder %s802_s30, %s796_s6 }
 0x176   : > { %p799_p6 = pneg %p798_p12 }
 0x177   : > { %p805_p1 = por %p804_p10, %p803_p9 }
 0x179   : > { %p806_p4 = pnand %p805_p1, %p799_p6 }
 0x17b   : > { %809 = shalt.err (!%p806_p4)
}
 0x17c   : > { %s810_s22 = scalar_lea.hbm %s412_s4, 128  ;;  %s814_s7 = scalar_lea.hbm %s1285_s3, 256 }
 0x17d   : > { %p811_p5 = scmp.ne.s32.totalorder %s412_s4, %s810_s22  ;;  %p815_p11 = scmp.lt.s32.totalorder %s412_s4, %s1285_s3 }
 0x17e   : > { %p816_p8 = scmp.lt.s32.totalorder %s814_s7, %s810_s22 }
 0x17f   : > { %p812_p3 = pnand %p811_p5, %p1315_p7 }
 0x180   : > { %p817_p0 = por %p816_p8, %p815_p11 }
 0x181   : > { %p813_p2 = pneg %p812_p3 }
 0x183   : > { %p818_p13 = pnand %p817_p0, %p813_p2 }
 0x185   : > { %821 = shalt.err (!%p818_p13)
}
 0x186   : > { %599 = dma.vmem_to_hbm [thread:$0]  (%p1315_p7), %s415_s29, 128, %s412_s4, %s399_s0  }
 0x187 PF: > { %s1316_s26 = sld [smem:[#allocation12_spill]]  ;;  %p613_p12 = scmp.ge.s32.totalorder %s944_s25, 2 }
 0x188   : > { %s1317_s20 = sld [smem:[#allocation20_spill]] }
 0x18d   : > { %s426_s27 = sand.u32 1, %s1316_s26  }
 0x18e   : > { %p1318_p6 = scmp.ne.s32.totalorder %s1317_s20, 0  ;;  %s427_s18 = scalar_lea.sflag [#allocation5], %s426_s27 }
 0x190   : > { %p609_p9 = pnand %p613_p12, %p1318_p6 }
 0x192   : > { %p610_p10 = pneg %p609_p9 }
 0x194   : > { %887 = dma.done.wait (%p610_p10), %s427_s18, 128  }
 0x195   : > { %889 = vsyncadd (%p610_p10), %s427_s18, 4294967168  ;;  %s22_s25 = sadd.s32 1, %s944_s25   ;;  %s1320_s9 = sld [smem:[#allocation13_spill]] }
 0x196   : > { %p1235_p1 = scmp.ge.s32.totalorder %s22_s25, 6   ;;  %s1321_s14 = sld [smem:[#allocation19_spill]] }
 0x197   : > { %s1322_s21 = sld [smem:[#allocation18_spill]]  ;;  %s1327_s12 = smov %s896_s13 }
 0x198   : > { %s1323_s4 = sld [smem:[#allocation14_spill]]  ;;  %s1329_s15 = smov %s908_s16 }
 0x199   : > { %s1324_s20 = sld [smem:[#allocation17_spill]]  ;;  %s1330_s16 = smov %s912_s17 }
 0x19a   : > { %s1325_s29 = sld [smem:[#allocation15_spill]]  ;;  %s1332_s18 = smov %s920_s19 }
 0x19b   : > { %s1326_s0 = sld [smem:[#allocation16_spill]]  ;;  %s1328_s13 = smov %s1320_s9 }
 0x19c   : > { %s1335_s22 = smov %s940_s24 }
 0x19d   : > { %s1331_s17 = smov %s1322_s21  ;;  %s1334_s21 = smov %s936_s23 }
 0x19e   : > { %s1333_s19 = smov %s1323_s4  ;;  %21 = sbr.rel (!%p1235_p1) target bundleno = 14 (0xe), region = 101 }
 0x1a0   : > { %s1336_s23 = smov %s1325_s29 }
 0x1a1   : > { %s1337_s24 = smov %s1326_s0 }
 0x1a3   :  { %432 = vsyncpa [#allocation4], 1 }
 0x1a4   :  { %434 = vsyncpa [#allocation4 + $0x1], 1 }
 0x1a5   :  { %435 = vsyncpa [#allocation7], 1 }
 0x1a6   :  { %437 = vsyncpa [#allocation7 + $0x1], 1 }
 0x1a7   :  { %438 = vsyncpa [#allocation5], 1 }
 0x1a8   :  { %440 = vsyncpa [#allocation5 + $0x1], 1 }

</bundles_post_ra>
